<compile_context>
chip_gen: v7x
topology: tpu7x:2x2x1
jax: 0.10.0
libtpu: 0.0.40
codegen_flags: <defaults>
</compile_context>

<pallas_src>
import functools

import jax
import jax.numpy as jnp
from jax.experimental import pallas as pl
from jax.experimental.pallas import tpu as pltpu

HIDDEN = 32              # feature width of the MLP
PACK = 4                 # batch rows packed into the lane dimension
LANES = PACK * HIDDEN    # 128 == TPU lane width


def _cdiv(a, b):
    return -(-a // b)


def _round_up(n, m):
    return ((n + m - 1) // m) * m


def _tpu_flavor():
    """(two_tensorcores, bm4_cap, use_mxu_softmax) for the local TPU generation."""
    kind = ""
    try:
        kind = jax.devices()[0].device_kind.lower()
    except Exception:
        pass
    is_v5e = ("v5 lite" in kind) or ("v5e" in kind)
    # Chips that expose 2 TensorCores to a single program (megacore / v7x).
    two_tc = any(tag in kind for tag in ("7", "v4", "v5p"))
    # v7x: 64 MiB VMEM -> keep tiles ~half of what v5e/v6e (128 MiB) get.
    bm4_cap = 2048 if "7" in kind else 4096
    # v5e is MXU-bound for this kernel: keep the XLU softmax (free slot) instead
    # of adding a 4th matmul.  v6e/v7x are HBM-bound: MXU group-sum is free there.
    return two_tc, bm4_cap, (not is_v5e)


def _choose_tiling(b4, two_cores, bm4_cap):
    """Pick (packed-row tile bm4, grid steps) for b4 packed rows."""
    bm4_cap = max(8, _round_up(bm4_cap, 8))
    if two_cores and b4 > 8:
        # >= 2 grid steps, even count, so both TensorCores get equal work.
        steps = max(2, 2 * _cdiv(b4, 2 * bm4_cap))
        bm4 = _round_up(_cdiv(b4, steps), 8)
        steps = _cdiv(b4, bm4)
        if steps > 1 and steps % 2:
            steps += 1                      # keep megacore sharding balanced
    else:
        bm4 = min(_round_up(b4, 8), bm4_cap)
        steps = _cdiv(b4, bm4)
    return bm4, steps


def bp_net_kernel(x_ref, w_ref, b_ref, o_ref, *, mxu_softmax):
    x = x_ref[...]                                       # (bm4, 128) f32

    # Linear -> ReLU -> Linear -> ReLU -> Linear, all lane-dense on the MXU/VPU.
    h = jnp.dot(x, w_ref[0], preferred_element_type=jnp.float32) + b_ref[0]
    h = jnp.maximum(h, 0.0)
    h = jnp.dot(h, w_ref[1], preferred_element_type=jnp.float32) + b_ref[1]
    h = jnp.maximum(h, 0.0)
    logits = jnp.dot(h, w_ref[2], preferred_element_type=jnp.float32) + b_ref[2]

    if mxu_softmax:
        # Lane-dense softmax (v6e/v7x): a single per-row 128-lane max is a valid
        # stabilizer (softmax is shift-invariant); per-group denominators come from
        # one MXU matmul with kron(I4, ones(32,32)) and are already broadcast across
        # each group's 32 lanes.  Caveat: a group whose logits sit >~85 below the
        # row max would underflow -- impossible for this small MLP's logit range.
        m = jnp.max(logits, axis=-1, keepdims=True)      # (bm4, 1)  XLU
        e = jnp.exp(logits - m)                          # (bm4, 128) EUP, full vreg
        denom = jnp.dot(e, w_ref[3], preferred_element_type=jnp.float32)
        o_ref[...] = (e * pl.reciprocal(denom, approx=False)).astype(o_ref.dtype)
    else:
        # Per-group softmax (v5e): XLU reductions ride in a free slot while the
        # MXU is the bottleneck, so we avoid the extra matmul there.
        outs = []
        for g in range(PACK):
            lg = logits[:, g * HIDDEN:(g + 1) * HIDDEN]  # (bm4, 32) static slice
            m = jnp.max(lg, axis=-1, keepdims=True)
            e = jnp.exp(lg - m)
            denom = jnp.sum(e, axis=-1, keepdims=True)
            outs.append(e * pl.reciprocal(denom, approx=False))
        o_ref[...] = jnp.concatenate(outs, axis=-1).astype(o_ref.dtype)


def prepare_params(params):
    """One-time weight prep (call once, NOT per forward):
    pre-transpose to (in, out), expand to 128x128 block-diagonal, tile biases
    across the 4 packed groups, and append the group-sum matrix used by the
    lane-dense softmax.  Weights -> (4,128,128), biases -> (3,1,128)."""
    eye = jnp.eye(PACK, dtype=jnp.float32)
    ws = [jnp.kron(eye, params[f"w{l}"].astype(jnp.float32).T) for l in (1, 2, 3)]
    ws.append(jnp.kron(eye, jnp.ones((HIDDEN, HIDDEN), jnp.float32)))  # group-sum
    bs = [jnp.tile(params[f"b{l}"].astype(jnp.float32), PACK).reshape(1, LANES)
          for l in (1, 2, 3)]
    return jnp.stack(ws), jnp.stack(bs)


def bp_net_forward(x, prepared):
    """x: (B, 32) float32.  prepared: output of prepare_params(params)."""
    w_stk, b_stk = prepared
    B, F = x.shape
    assert F == HIDDEN

    two_tc, bm4_cap, mxu_softmax = _tpu_flavor()
    b4 = _cdiv(B, PACK)
    bm4, steps = _choose_tiling(b4, two_tc, bm4_cap)
    b_padded = steps * bm4 * PACK

    # Pad only when the batch is not already tile-aligned; allow_input_fusion lets
    # the pad+reshape fuse into the kernel's input DMA instead of a separate pass.
    if b_padded != B:
        x = jnp.pad(x, ((0, b_padded - B), (0, 0)))
    x_packed = x.reshape(steps * bm4, LANES)

    out_packed = pl.pallas_call(
        functools.partial(bp_net_kernel, mxu_softmax=mxu_softmax),
        out_shape=jax.ShapeDtypeStruct((steps * bm4, LANES), jnp.float32),
        grid_spec=pltpu.PrefetchScalarGridSpec(
            num_scalar_prefetch=0,
            grid=(steps,),
            in_specs=[
                pl.BlockSpec((bm4, LANES), lambda i: (i, 0)),            # activations
                pl.BlockSpec((4, LANES, LANES), lambda i: (0, 0, 0)),    # 3 weights + group-sum
                pl.BlockSpec((3, 1, LANES), lambda i: (0, 0, 0)),        # 3 biases
            ],
            out_specs=pl.BlockSpec((bm4, LANES), lambda i: (i, 0)),
        ),
        compiler_params=pltpu.CompilerParams(
            dimension_semantics=("parallel",),
            allow_input_fusion=[0],
        ),
    )(x_packed, w_stk, b_stk)

    out = out_packed.reshape(b_padded, HIDDEN)
    return out if b_padded == B else out[:B]


def init_params(key):
    """Deterministic init mimicking PyTorch nn.Linear default (U(-1/sqrt(fan_in), +))."""
    bound = 1.0 / jnp.sqrt(jnp.float32(HIDDEN))
    keys = jax.random.split(key, 6)

    def u(k, shape):
        return jax.random.uniform(k, shape, jnp.float32, -bound, bound)

    return {
        "w1": u(keys[0], (HIDDEN, HIDDEN)), "b1": u(keys[1], (HIDDEN,)),
        "w2": u(keys[2], (HIDDEN, HIDDEN)), "b2": u(keys[3], (HIDDEN,)),
        "w3": u(keys[4], (HIDDEN, HIDDEN)), "b3": u(keys[5], (HIDDEN,)),
    }


def reference_forward(x, p):
    h1 = jnp.maximum(x @ p["w1"].T + p["b1"], 0.0)
    h2 = jnp.maximum(h1 @ p["w2"].T + p["b2"], 0.0)
    logits = h2 @ p["w3"].T + p["b3"]
    return jax.nn.softmax(logits, axis=-1)


if __name__ == "__main__":
    key = jax.random.PRNGKey(0)
    kx, kp, kx2 = jax.random.split(key, 3)

    params = init_params(kp)
    prepared = prepare_params(params)   # one-time weight prep (outside forward)

    fwd = jax.jit(lambda xx: bp_net_forward(xx, prepared))

    # Primary small-shape check (batch=8, hidden=32).
    B = 8
    x = jax.random.normal(kx, (B, HIDDEN), dtype=jnp.float32)
    out = jax.block_until_ready(fwd(x))
    ref = reference_forward(x, params)
    assert out.shape == (B, HIDDEN)
    assert jnp.allclose(out, ref, atol=1e-5, rtol=1e-5)

    # Tail / padding path: batch not a multiple of the pack or tile sizes.
    B2 = 200
    x2 = jax.random.normal(kx2, (B2, HIDDEN), dtype=jnp.float32)
    out2 = jax.block_until_ready(fwd(x2))
    ref2 = reference_forward(x2, params)
    assert out2.shape == (B2, HIDDEN)
    assert jnp.allclose(out2, ref2, atol=1e-5, rtol=1e-5)

    print("KERNEL_OK")
</pallas_src>

<mosaic_0001>
module attributes {stable_mosaic.version = 11 : i64} {
  func.func @bp_net_kernel(%arg0: i32, %arg1: memref<8x128xf32, #tpu.memory_space<vmem>>, %arg2: memref<4x128x128xf32, #tpu.memory_space<vmem>>, %arg3: memref<3x1x128xf32, #tpu.memory_space<vmem>>, %arg4: memref<8x128xf32, #tpu.memory_space<vmem>>) attributes {dimension_semantics = [#tpu.dimension_semantics<parallel>], iteration_bounds = array<i64: 1>, scalar_prefetch = 0 : i64, scratch_operands = 0 : i64, tpu.core_type = #tpu.core_type<tc>, window_params = [{transform_indices = @transform_0, window_bounds = array<i64: 8, 128>}, {pipeline_mode = #tpu.pipeline_mode<synchronous>, transform_indices = @transform_1, window_bounds = array<i64: 4, 128, 128>}, {pipeline_mode = #tpu.pipeline_mode<synchronous>, transform_indices = @transform_2, window_bounds = array<i64: 3, 1, 128>}, {transform_indices = @transform_3, window_bounds = array<i64: 8, 128>}]} {
    %c0 = arith.constant 0 : index
    %c0_0 = arith.constant 0 : index
    %0 = vector.load %arg1[%c0, %c0_0] : memref<8x128xf32, #tpu.memory_space<vmem>>, vector<8x128xf32>
    %c0_1 = arith.constant 0 : index
    %c0_2 = arith.constant 0 : index
    %c0_3 = arith.constant 0 : index
    %1 = vector.load %arg2[%c0_1, %c0_2, %c0_3] : memref<4x128x128xf32, #tpu.memory_space<vmem>>, vector<1x128x128xf32>
    %2 = vector.shape_cast %1 : vector<1x128x128xf32> to vector<128x128xf32>
    %cst = arith.constant dense<0.000000e+00> : vector<8x128xf32>
    %3 = tpu.matmul %0, %2, %cst {dimension_numbers = #tpu.dot_dimension_numbers<[1], [0], [0], [1], [0, 0, 1, 1], [], []>} : vector<8x128xf32>, vector<128x128xf32>, vector<8x128xf32> -> vector<8x128xf32>
    %c0_4 = arith.constant 0 : index
    %c0_5 = arith.constant 0 : index
    %c0_6 = arith.constant 0 : index
    %4 = vector.load %arg3[%c0_4, %c0_5, %c0_6] : memref<3x1x128xf32, #tpu.memory_space<vmem>>, vector<1x1x128xf32>
    %5 = vector.shape_cast %4 : vector<1x1x128xf32> to vector<1x128xf32>
    %6 = vector.broadcast %5 : vector<1x128xf32> to vector<8x128xf32>
    %7 = arith.addf %3, %6 : vector<8x128xf32>
    %cst_7 = arith.constant 0.000000e+00 : f32
    %8 = vector.broadcast %cst_7 : f32 to vector<8x128xf32>
    %9 = arith.maximumf %7, %8 : vector<8x128xf32>
    %c1 = arith.constant 1 : index
    %c0_8 = arith.constant 0 : index
    %c0_9 = arith.constant 0 : index
    %10 = vector.load %arg2[%c1, %c0_8, %c0_9] : memref<4x128x128xf32, #tpu.memory_space<vmem>>, vector<1x128x128xf32>
    %11 = vector.shape_cast %10 : vector<1x128x128xf32> to vector<128x128xf32>
    %cst_10 = arith.constant dense<0.000000e+00> : vector<8x128xf32>
    %12 = tpu.matmul %9, %11, %cst_10 {dimension_numbers = #tpu.dot_dimension_numbers<[1], [0], [0], [1], [0, 0, 1, 1], [], []>} : vector<8x128xf32>, vector<128x128xf32>, vector<8x128xf32> -> vector<8x128xf32>
    %c1_11 = arith.constant 1 : index
    %c0_12 = arith.constant 0 : index
    %c0_13 = arith.constant 0 : index
    %13 = vector.load %arg3[%c1_11, %c0_12, %c0_13] : memref<3x1x128xf32, #tpu.memory_space<vmem>>, vector<1x1x128xf32>
    %14 = vector.shape_cast %13 : vector<1x1x128xf32> to vector<1x128xf32>
    %15 = vector.broadcast %14 : vector<1x128xf32> to vector<8x128xf32>
    %16 = arith.addf %12, %15 : vector<8x128xf32>
    %cst_14 = arith.constant 0.000000e+00 : f32
    %17 = vector.broadcast %cst_14 : f32 to vector<8x128xf32>
    %18 = arith.maximumf %16, %17 : vector<8x128xf32>
    %c2 = arith.constant 2 : index
    %c0_15 = arith.constant 0 : index
    %c0_16 = arith.constant 0 : index
    %19 = vector.load %arg2[%c2, %c0_15, %c0_16] : memref<4x128x128xf32, #tpu.memory_space<vmem>>, vector<1x128x128xf32>
    %20 = vector.shape_cast %19 : vector<1x128x128xf32> to vector<128x128xf32>
    %cst_17 = arith.constant dense<0.000000e+00> : vector<8x128xf32>
    %21 = tpu.matmul %18, %20, %cst_17 {dimension_numbers = #tpu.dot_dimension_numbers<[1], [0], [0], [1], [0, 0, 1, 1], [], []>} : vector<8x128xf32>, vector<128x128xf32>, vector<8x128xf32> -> vector<8x128xf32>
    %c2_18 = arith.constant 2 : index
    %c0_19 = arith.constant 0 : index
    %c0_20 = arith.constant 0 : index
    %22 = vector.load %arg3[%c2_18, %c0_19, %c0_20] : memref<3x1x128xf32, #tpu.memory_space<vmem>>, vector<1x1x128xf32>
    %23 = vector.shape_cast %22 : vector<1x1x128xf32> to vector<1x128xf32>
    %24 = vector.broadcast %23 : vector<1x128xf32> to vector<8x128xf32>
    %25 = arith.addf %21, %24 : vector<8x128xf32>
    %cst_21 = arith.constant dense<0xFF800000> : vector<8xf32>
    %26 = vector.multi_reduction <maximumf>, %25, %cst_21 [1] : vector<8x128xf32> to vector<8xf32>
    %27 = vector.shape_cast %26 : vector<8xf32> to vector<8x1xf32>
    %28 = vector.broadcast %27 : vector<8x1xf32> to vector<8x128xf32>
    %29 = arith.subf %25, %28 : vector<8x128xf32>
    %30 = math.exp %29 : vector<8x128xf32>
    %c3 = arith.constant 3 : index
    %c0_22 = arith.constant 0 : index
    %c0_23 = arith.constant 0 : index
    %31 = vector.load %arg2[%c3, %c0_22, %c0_23] : memref<4x128x128xf32, #tpu.memory_space<vmem>>, vector<1x128x128xf32>
    %32 = vector.shape_cast %31 : vector<1x128x128xf32> to vector<128x128xf32>
    %cst_24 = arith.constant dense<0.000000e+00> : vector<8x128xf32>
    %33 = tpu.matmul %30, %32, %cst_24 {dimension_numbers = #tpu.dot_dimension_numbers<[1], [0], [0], [1], [0, 0, 1, 1], [], []>} : vector<8x128xf32>, vector<128x128xf32>, vector<8x128xf32> -> vector<8x128xf32>
    %34 = tpu.reciprocal %33 : vector<8x128xf32> -> vector<8x128xf32>
    %35 = arith.mulf %30, %34 : vector<8x128xf32>
    %c0_25 = arith.constant 0 : index
    %c0_26 = arith.constant 0 : index
    %36 = vector.load %arg4[%c0_25, %c0_26] : memref<8x128xf32, #tpu.memory_space<vmem>>, vector<8x128xf32>
    tpu.vector_store %arg4[%c0_25, %c0_26], %35 {strides = array<i32>} : memref<8x128xf32, #tpu.memory_space<vmem>>, vector<8x128xf32>,
    return
  }
  func.func @transform_0(%arg0: i32) -> (i32, i32) {
    %c0_i32 = arith.constant 0 : i32
    %c0_i32_0 = arith.constant 0 : i32
    return %arg0, %c0_i32 : i32, i32
  }
  func.func @transform_1(%arg0: i32) -> (i32, i32, i32) {
    %c0_i32 = arith.constant 0 : i32
    %c0_i32_0 = arith.constant 0 : i32
    %c0_i32_1 = arith.constant 0 : i32
    %c0_i32_2 = arith.constant 0 : i32
    return %c0_i32, %c0_i32_0, %c0_i32_1 : i32, i32, i32
  }
  func.func @transform_2(%arg0: i32) -> (i32, i32, i32) {
    %c0_i32 = arith.constant 0 : i32
    %c0_i32_0 = arith.constant 0 : i32
    %c0_i32_1 = arith.constant 0 : i32
    %c0_i32_2 = arith.constant 0 : i32
    return %c0_i32, %c0_i32_0, %c0_i32_1 : i32, i32, i32
  }
  func.func @transform_3(%arg0: i32) -> (i32, i32) {
    %c0_i32 = arith.constant 0 : i32
    %c0_i32_0 = arith.constant 0 : i32
    return %arg0, %c0_i32 : i32, i32
  }
}

</mosaic_0001>

<bundles_post_ra>
// kernel: _lambda_.1
= control target key start
LH: loop header
LB: loop body
LE: loop exit
PB: predicated region body
PF: predicated region fallthrough
CT: control target
= control target key end

     0   :  { %8 = vsyncpa [#allocation3], 0  ;;  %s757_s12 = smov [#allocation2]   ;;  %s850_s0 = inlined_call_operand.vmem [shape: f32[8,128], index: 0, kind: input, shape index: {}]   ;;  %s851_s1 = inlined_call_operand.hbm [shape: f32[4,128,128], index: 1, kind: input, shape index: {}]   ;;  %s852_s2 = inlined_call_operand.vmem [shape: f32[3,1,128], index: 2, kind: input, shape index: {}]   ;;  %s853_s3 = inlined_call_operand.vmem [shape: f32[8,128], index: 3, kind: output, shape index: {}]  }
   0x1   :  { %s16_s13 = sshll.u32 %s757_s12, 4  ;;  %s733_s16 = scalar_lea.hbm %s851_s1, 8192  ;;  %s17_s13 = int_to_ptr.vmem [resolvable:$true] %s16_s13 }
   0x2   :  { %p734_p0 = scmp.ne.s32.totalorder %s851_s1, %s733_s16  ;;  %p737_p1 = scmp.lt.u32.totalorder %s733_s16, %s851_s1 }
   0x4   :  { %p739_p2 = pnand %p737_p1, %p734_p0 }
   0x6   :  { %742 = shalt.err (!%p739_p2)
}
   0x7   :  { %s743_s21 = scalar_lea.vmem %s17_s13, 8192  ;;  %p748_p4 = scmp.lt.s32.totalorder %s17_s13, %s17_s13 }
   0x8   :  { %p744_p3 = scmp.ne.s32.totalorder %s17_s13, %s743_s21  ;;  %p749_p5 = scmp.lt.s32.totalorder %s743_s21, %s743_s21 }
   0xa   :  { %p750_p6 = por %p749_p5, %p748_p4 }
   0xc   :  { %p751_p7 = pnand %p750_p6, %p744_p3 }
   0xe   :  { %754 = shalt.err (!%p751_p7)
}
   0xf   :  { %s758_s22 = smov 128   ;;  %s759_s23 = smov 8  }
  0x10   :  { %22 = dma.hbm_to_vmem [thread:$0]  %s851_s1, 8192, %s17_s13, [#allocation3], %s758_s22, %s758_s22, %s759_s23  }
  0x11   :  { %755 = dma.done.wait [#allocation3], 8192  }
  0x12   :  { %756 = vsyncadd [#allocation3], 4294959104  ;;  %v760_v0 = vmov 0.0|0.0   ;;  %vm761_vm0 = vmmov 0   ;;  %v762_v1 = vmov 0.0   ;;  %v29_v2 = vld [vmem:[#allocation2] sm:$0xff] }
  0x13   :  { %627 = vmatprep.subr.bf16.mxu0 %v760_v0  ;;  %519 = vmatprep.mubr.msk.f32.mxu0 %vm761_vm0, %v762_v1  ;;  %v30_v3 = vld [vmem:[#allocation2 + $0x8] sm:$0xff]  ;;  %v31_v4 = vld [vmem:[#allocation2 + $0x10] sm:$0xff]  ;;  %v32_v6 = vld [vmem:[#allocation2 + $0x18] sm:$0xff] }
  0x14   :  { %651 = vmatprep.subr.bf16.mxu1 %v760_v0  ;;  %554 = vmatprep.mubr.msk.f32.mxu1 %vm761_vm0, %v762_v1  ;;  %v628_v5 = vpack.c.bf16 %v30_v3, %v29_v2  ;;  %v631_v7 = vpack.c.bf16 %v32_v6, %v31_v4  ;;  %v33_v8 = vld [vmem:[#allocation2 + $0x20] sm:$0xff]  ;;  %v34_v9 = vld [vmem:[#allocation2 + $0x28] sm:$0xff]  ;;  %v126_v12 = vld [vmem:[#allocation2 + $0x90] sm:$0xff] }
  0x15   :  { %v124_v10 = vld [vmem:[#allocation2 + $0x80] sm:$0xff]  ;;  %v125_v11 = vld [vmem:[#allocation2 + $0x88] sm:$0xff]  ;;  %v127_v13 = vld [vmem:[#allocation2 + $0x98] sm:$0xff]  ;;  %v634_v14 = vpack.c.bf16 %v34_v9, %v33_v8 }
  0x16   :  { %629 = vmatpush3.bf16.msra.mxu0 %v628_v5  ;;  %v652_v15 = vpack.c.bf16 %v125_v11, %v124_v10  ;;  %v35_v16 = vld [vmem:[#allocation2 + $0x30] sm:$0xff]  ;;  %v36_v17 = vld [vmem:[#allocation2 + $0x38] sm:$0xff]  ;;  %v655_v18 = vpack.c.bf16 %v127_v13, %v126_v12  ;;  %v128_v19 = vld [vmem:[#allocation2 + $0xa0] sm:$0xff] }
  0x17   :  { %630 = vmatprep.subr.bf16.mxu0 %v760_v0  ;;  %v129_v20 = vld [vmem:[#allocation2 + $0xa8] sm:$0xff]  ;;  %v637_v21 = vpack.c.bf16 %v36_v17, %v35_v16  ;;  %v37_v22 = vld [vmem:[#allocation2 + $0x40] sm:$0xff]  ;;  %v130_v25 = vld [vmem:[#allocation2 + $0xb0] sm:$0xff] }
  0x18   :  { %653 = vmatpush3.bf16.msra.mxu1 %v652_v15  ;;  %v38_v23 = vld [vmem:[#allocation2 + $0x48] sm:$0xff]  ;;  %v658_v24 = vpack.c.bf16 %v129_v20, %v128_v19  ;;  %v131_v26 = vld [vmem:[#allocation2 + $0xb8] sm:$0xff]  ;;  %v39_v28 = vld [vmem:[#allocation2 + $0x50] sm:$0xff] }
  0x19   :  { %654 = vmatprep.subr.bf16.mxu1 %v760_v0  ;;  %v640_v27 = vpack.c.bf16 %v38_v23, %v37_v22  ;;  %v40_v29 = vld [vmem:[#allocation2 + $0x58] sm:$0xff]  ;;  %v661_v30 = vpack.c.bf16 %v131_v26, %v130_v25  ;;  %v132_v31 = vld [vmem:[#allocation2 + $0xc0] sm:$0xff]  ;;  %v133_v32 = vld [vmem:[#allocation2 + $0xc8] sm:$0xff] }
  0x1a   :  { %632 = vmatpush3.bf16.msra.mxu0 %v631_v7  ;;  %v643_v33 = vpack.c.bf16 %v40_v29, %v39_v28  ;;  %v41_v34 = vld [vmem:[#allocation2 + $0x60] sm:$0xff]  ;;  %v42_v35 = vld [vmem:[#allocation2 + $0x68] sm:$0xff]  ;;  %v664_v36 = vpack.c.bf16 %v133_v32, %v132_v31  ;;  %v134_v37 = vld [vmem:[#allocation2 + $0xd0] sm:$0xff] }
  0x1b   :  { %633 = vmatprep.subr.bf16.mxu0 %v760_v0  ;;  %v135_v38 = vld [vmem:[#allocation2 + $0xd8] sm:$0xff]  ;;  %v646_v39 = vpack.c.bf16 %v42_v35, %v41_v34  ;;  %v43_v40 = vld [vmem:[#allocation2 + $0x70] sm:$0xff]  ;;  %v136_v43 = vld [vmem:[#allocation2 + $0xe0] sm:$0xff] }
  0x1c   :  { %656 = vmatpush3.bf16.msra.mxu1 %v655_v18  ;;  %v44_v41 = vld [vmem:[#allocation2 + $0x78] sm:$0xff]  ;;  %v667_v42 = vpack.c.bf16 %v135_v38, %v134_v37  ;;  %v137_v44 = vld [vmem:[#allocation2 + $0xe8] sm:$0xff]  ;;  %v28_v47 = vld [vmem:[%s850_s0] sm:$0xff] }
  0x1d   :  { %657 = vmatprep.subr.bf16.mxu1 %v760_v0  ;;  %v649_v45 = vpack.c.bf16 %v44_v41, %v43_v40  ;;  %v670_v46 = vpack.c.bf16 %v137_v44, %v136_v43  ;;  %v138_v48 = vld [vmem:[#allocation2 + $0xf0] sm:$0xff]  ;;  %v139_v49 = vld [vmem:[#allocation2 + $0xf8] sm:$0xff]  ;;  %v220_v51 = vld [vmem:[#allocation2 + $0x100] sm:$0xff] }
  0x1e   :  { %635 = vmatpush3.bf16.msra.mxu0 %v634_v14  ;;  %v673_v50 = vpack.c.bf16 %v139_v49, %v138_v48  ;;  %v221_v52 = vld [vmem:[#allocation2 + $0x108] sm:$0xff]  ;;  %v222_v53 = vld [vmem:[#allocation2 + $0x110] sm:$0xff]  ;;  %v223_v55 = vld [vmem:[#allocation2 + $0x118] sm:$0xff] }
  0x1f   :  { %636 = vmatprep.subr.bf16.mxu0 %v760_v0  ;;  %v676_v54 = vpack.c.bf16 %v221_v52, %v220_v51  ;;  %v679_v56 = vpack.c.bf16 %v223_v55, %v222_v53  ;;  %v224_v57 = vld [vmem:[#allocation2 + $0x120] sm:$0xff]  ;;  %v225_v58 = vld [vmem:[#allocation2 + $0x128] sm:$0xff]  ;;  %v226_v60 = vld [vmem:[#allocation2 + $0x130] sm:$0xff] }
  0x20   :  { %659 = vmatpush3.bf16.msra.mxu1 %v658_v24  ;;  %v682_v59 = vpack.c.bf16 %v225_v58, %v224_v57  ;;  %v227_v61 = vld [vmem:[#allocation2 + $0x138] sm:$0xff]  ;;  %v228_v63 = vld [vmem:[#allocation2 + $0x140] sm:$0xff]  ;;  %v229_v2 = vld [vmem:[#allocation2 + $0x148] sm:$0xff] }
  0x21   :  { %660 = vmatprep.subr.bf16.mxu1 %v760_v0  ;;  %v685_v62 = vpack.c.bf16 %v227_v61, %v226_v60  ;;  %v688_v3 = vpack.c.bf16 %v229_v2, %v228_v63  ;;  %v230_v4 = vld [vmem:[#allocation2 + $0x150] sm:$0xff]  ;;  %v231_v5 = vld [vmem:[#allocation2 + $0x158] sm:$0xff]  ;;  %v232_v7 = vld [vmem:[#allocation2 + $0x160] sm:$0xff] }
  0x22   :  { %638 = vmatpush3.bf16.msra.mxu0 %v637_v21  ;;  %v691_v6 = vpack.c.bf16 %v231_v5, %v230_v4  ;;  %v233_v8 = vld [vmem:[#allocation2 + $0x168] sm:$0xff]  ;;  %v414_v10 = vld [vmem:[%s852_s2] ss:$0 sm:$0xff]  ;;  %v234_v15 = vld [vmem:[#allocation2 + $0x170] sm:$0xff] }
  0x23   :  { %639 = vmatprep.subr.bf16.mxu0 %v760_v0  ;;  %v694_v9 = vpack.c.bf16 %v233_v8, %v232_v7  ;;  %v235_v16 = vld [vmem:[#allocation2 + $0x178] sm:$0xff]  ;;  %v416_v18 = vld [vmem:[%s852_s2 + $0x1] ss:$0 sm:$0xff]  ;;  %v321_v24 = vld [vmem:[#allocation2 + $0x188] sm:$0xff] }
  0x24   :  { %662 = vmatpush3.bf16.msra.mxu1 %v661_v30  ;;  %v697_v17 = vpack.c.bf16 %v235_v16, %v234_v15  ;;  %v320_v23 = vld [vmem:[#allocation2 + $0x180] sm:$0xff]  ;;  %v322_v25 = vld [vmem:[#allocation2 + $0x190] sm:$0xff]  ;;  %v325_v29 = vld [vmem:[#allocation2 + $0x1a8] sm:$0xff] }
  0x25   :  { %663 = vmatprep.subr.bf16.mxu1 %v760_v0  ;;  %v700_v26 = vpack.c.bf16 %v321_v24, %v320_v23  ;;  %v324_v28 = vld [vmem:[#allocation2 + $0x1a0] sm:$0xff]  ;;  %v326_v31 = vld [vmem:[#allocation2 + $0x1b0] sm:$0xff]  ;;  %v327_v32 = vld [vmem:[#allocation2 + $0x1b8] sm:$0xff] }
  0x26   :  { %641 = vmatpush3.bf16.msra.mxu0 %v640_v27  ;;  %v323_v27 = vld [vmem:[#allocation2 + $0x198] sm:$0xff]  ;;  %v706_v30 = vpack.c.bf16 %v325_v29, %v324_v28  ;;  %v418_v34 = vld [vmem:[%s852_s2 + $0x2] ss:$0 sm:$0xff]  ;;  %v330_v41 = vld [vmem:[#allocation2 + $0x1d0] sm:$0xff] }
  0x27   :  { %642 = vmatprep.subr.bf16.mxu0 %v760_v0  ;;  %v328_v38 = vld [vmem:[#allocation2 + $0x1c0] sm:$0xff]  ;;  %v335_v48 = vld [vmem:[#allocation2 + $0x1f8] sm:$0xff] }
  0x28   :  { %665 = vmatpush3.bf16.msra.mxu1 %v664_v36  ;;  %v332_v44 = vld [vmem:[#allocation2 + $0x1e0] sm:$0xff] }
  0x29   :  { %666 = vmatprep.subr.bf16.mxu1 %v760_v0 }
  0x2a   :  { %644 = vmatpush3.bf16.msra.mxu0 %v643_v33  ;;  %v709_v33 = vpack.c.bf16 %v327_v32, %v326_v31 }
  0x2b   :  { %645 = vmatprep.subr.bf16.mxu0 %v760_v0 }
  0x2c   :  { %668 = vmatpush3.bf16.msra.mxu1 %v667_v42  ;;  %v331_v42 = vld [vmem:[#allocation2 + $0x1d8] sm:$0xff] }
  0x2d   :  { %669 = vmatprep.subr.bf16.mxu1 %v760_v0  ;;  %v715_v43 = vpack.c.bf16 %v331_v42, %v330_v41 }
  0x2e   :  { %647 = vmatpush3.bf16.msra.mxu0 %v646_v39  ;;  %v329_v39 = vld [vmem:[#allocation2 + $0x1c8] sm:$0xff] }
  0x2f   :  { %648 = vmatprep.subr.bf16.mxu0 %v760_v0  ;;  %v712_v40 = vpack.c.bf16 %v329_v39, %v328_v38 }
  0x30   :  { %671 = vmatpush3.bf16.msra.mxu1 %v670_v46 }
  0x31   :  { %672 = vmatprep.subr.bf16.mxu1 %v760_v0 }
  0x32   :  { %650 = vmatpush3.bf16.msra.mxu0 %v649_v45  ;;  %v333_v45 = vld [vmem:[#allocation2 + $0x1e8] sm:$0xff] }
  0x33   :  { %675 = vmatprep.subr.bf16.mxu0 %v760_v0  ;;  %v718_v46 = vpack.c.bf16 %v333_v45, %v332_v44 }
  0x34   :  { %674 = vmatpush3.bf16.msra.mxu1 %v673_v50 }
  0x35   :  { %520 = vmatmul.mubr.f32.vlgmr.msra.gmra.mrb[0].mxu0 %v28_v47  ;;  %699 = vmatprep.subr.bf16.mxu1 %v760_v0  ;;  %v334_v47 = vld [vmem:[#allocation2 + $0x1f0] sm:$0xff] }
  0x36   :  { %589 = vmatprep.mubr.msk.f32.mxu0 %vm761_vm0, %v762_v1  ;;  %677 = vmatpush3.bf16.msra.mxu0 %v676_v54  ;;  %v721_v49 = vpack.c.bf16 %v335_v48, %v334_v47 }
  0x37   :  { %678 = vmatprep.subr.bf16.mxu0 %v760_v0 }
  0x3a   :  { %680 = vmatpush3.bf16.msra.mxu0 %v679_v56 }
  0x3b   :  { %681 = vmatprep.subr.bf16.mxu0 %v760_v0 }
  0x3e   :  { %683 = vmatpush3.bf16.msra.mxu0 %v682_v59 }
  0x3f   :  { %684 = vmatprep.subr.bf16.mxu0 %v760_v0 }
  0x42   :  { %686 = vmatpush3.bf16.msra.mxu0 %v685_v62 }
  0x43   :  { %687 = vmatprep.subr.bf16.mxu0 %v760_v0 }
  0x46   :  { %689 = vmatpush3.bf16.msra.mxu0 %v688_v3 }
  0x47   :  { %690 = vmatprep.subr.bf16.mxu0 %v760_v0 }
  0x4a   :  { %692 = vmatpush3.bf16.msra.mxu0 %v691_v6 }
  0x4b   :  { %693 = vmatprep.subr.bf16.mxu0 %v760_v0 }
  0x4e   :  { %695 = vmatpush3.bf16.msra.mxu0 %v694_v9 }
  0x4f   :  { %696 = vmatprep.subr.bf16.mxu0 %v760_v0 }
  0x52   :  { %698 = vmatpush3.bf16.msra.mxu0 %v697_v17 }
 0x108   :  { %v118_v11 = vpop.f32.mrb[0].mxu0 }
 0x109   :  { %v119_v12 = vadd.f32 %v414_v10, %v118_v11  ;;  %v521_v13 = vpop.f32.mrb[1].mxu0 }
 0x10b   :  { %v122_v14 = vmax.f32 %v119_v12, 0.0 }
 0x10d   :  { %555 = vmatmul.mubr.f32.vlgmr.msra.gmra.mrb[0].mxu1 %v122_v14 }
 0x10e   :  { %624 = vmatprep.mubr.msk.f32.mxu1 %vm761_vm0, %v762_v1  ;;  %701 = vmatpush3.bf16.msra.mxu1 %v700_v26  ;;  %v703_v1 = vpack.c.bf16 %v323_v27, %v322_v25 }
 0x10f   :  { %702 = vmatprep.subr.bf16.mxu1 %v760_v0 }
 0x112   :  { %704 = vmatpush3.bf16.msra.mxu1 %v703_v1 }
 0x113   :  { %705 = vmatprep.subr.bf16.mxu1 %v760_v0 }
 0x116   :  { %707 = vmatpush3.bf16.msra.mxu1 %v706_v30 }
 0x117   :  { %708 = vmatprep.subr.bf16.mxu1 %v760_v0 }
 0x11a   :  { %710 = vmatpush3.bf16.msra.mxu1 %v709_v33 }
 0x11b   :  { %711 = vmatprep.subr.bf16.mxu1 %v760_v0 }
 0x11e   :  { %713 = vmatpush3.bf16.msra.mxu1 %v712_v40 }
 0x11f   :  { %714 = vmatprep.subr.bf16.mxu1 %v760_v0 }
 0x122   :  { %716 = vmatpush3.bf16.msra.mxu1 %v715_v43 }
 0x123   :  { %717 = vmatprep.subr.bf16.mxu1 %v760_v0 }
 0x126   :  { %719 = vmatpush3.bf16.msra.mxu1 %v718_v46 }
 0x127   :  { %720 = vmatprep.subr.bf16.mxu1 %v760_v0 }
 0x12a   :  { %722 = vmatpush3.bf16.msra.mxu1 %v721_v49 }
 0x1e0   :  { %v214_v19 = vpop.f32.mrb[0].mxu1 }
 0x1e1   :  { %v215_v20 = vadd.f32 %v416_v18, %v214_v19  ;;  %v556_v21 = vpop.f32.mrb[1].mxu1 }
 0x1e3   :  { %v218_v22 = vmax.f32 %v215_v20, 0.0 }
 0x1e5   :  { %590 = vmatmul.mubr.f32.vlgmr.msra.gmra.mrb[2].mxu0 %v218_v22 }
 0x2b8   :  { %v310_v35 = vpop.f32.mrb[2].mxu0 }
 0x2b9   :  { %v311_v36 = vadd.f32 %v418_v34, %v310_v35  ;;  %v591_v37 = vpop.f32.mrb[3].mxu0 }
 0x2bb   :  { %314 = vmax.xlane.f32.xlu0 %v311_v36 }
 0x348   :  { %v315_v50 = vpop.xlane.xlu0 %314 }
 0x349   :  { %v316_v51 = vsub.f32 %v311_v36, %v315_v50 }
 0x34b   :  { %v317_v52 = vmul.f32 1.442695, %v316_v51 }
 0x34d   :  { %729 = vpow2.f32 %v317_v52 }
 0x357   :  { %v730_v53 = vpop.eup %729 }
 0x358   :  { %625 = vmatmul.mubr.f32.vlgmr.msra.gmra.mrb[2].mxu1 %v730_v53 }
 0x42b   :  { %v402_v54 = vpop.f32.mrb[2].mxu1 }
 0x42c   :  { %731 = vrcp.f32 %v402_v54  ;;  %v626_v55 = vpop.f32.mrb[3].mxu1 }
 0x436   :  { %v732_v56 = vpop.eup %731 }
 0x437   :  { %v407_v57 = vmul.f32 %v732_v56, %v730_v53 }
 0x439   :  { %408 = vst [vmem:[%s853_s3] sm:$0xff] %v407_v57 }
 0x43a   :  { %413 = vsyncpa [#allocation3], 1 }

</bundles_post_ra>
